<compile_context>
chip_gen: v7x
topology: tpu7x:2x2x1
jax: 0.10.0
libtpu: 0.0.40
codegen_flags: <defaults>
</compile_context>

<pallas_src>
import jax
import jax.numpy as jnp
from jax.experimental import pallas as pl
from jax.experimental.pallas import tpu as pltpu


def _round_up(x, m):
    return ((x + m - 1) // m) * m


def _vmem_capacity_bytes():
    try:
        return int(pltpu.get_tpu_info().vmem_capacity_bytes)
    except Exception:
        return 64 << 20  # conservative: assume v7x-sized per-core VMEM


def _resident_kernel(x_ref, w1_ref, b1_ref, w2_ref, b2_ref, o_ref):
    # hidden = relu(x @ W1 + b1); kept as a live value (no explicit VMEM
    # round-trip — the extra vst/vld can bind on v5e's single store slot).
    h = jnp.dot(x_ref[...], w1_ref[...], preferred_element_type=jnp.float32)
    h = jnp.maximum(h + b1_ref[...], 0.0)          # b1 is (1, H_p), f32
    y = jnp.dot(h.astype(w2_ref.dtype), w2_ref[...],
                preferred_element_type=jnp.float32)
    o_ref[...] = (y + b2_ref[...]).astype(o_ref.dtype)


def _htiled_kernel(x_ref, w1_ref, b1_ref, w2_ref, b2_ref, o_ref, acc_ref):
    # Fallback path: hidden dim tiled; accumulate chunk contributions.
    j = pl.program_id(1)

    @pl.when(j == 0)
    def _():
        acc_ref[...] = jnp.zeros_like(acc_ref)

    h = jnp.dot(x_ref[...], w1_ref[...], preferred_element_type=jnp.float32)
    h = jnp.maximum(h + b1_ref[...], 0.0)
    acc_ref[...] += jnp.dot(h.astype(w2_ref.dtype), w2_ref[...],
                            preferred_element_type=jnp.float32)

    @pl.when(j == pl.num_programs(1) - 1)
    def _():
        o_ref[...] = (acc_ref[...] + b2_ref[...]).astype(o_ref.dtype)


def two_layer_net(x, w1, b1, w2, b2, *, tile_n=None, tile_h=None,
                  use_bf16=False, force_h_tiling=False):
    """Fused forward pass: relu(x @ w1 + b1) @ w2 + b2.

    x:  (N, D_in) f32,  w1: (D_in, H),  b1: (H,),  w2: (H, D_out),  b2: (D_out,)
    Returns (N, D_out) in x.dtype.
    """
    N, D_in = x.shape
    H = w1.shape[1]
    D_out = w2.shape[1]
    out_dtype = x.dtype
    mm_dtype = jnp.bfloat16 if use_bf16 else jnp.float32
    itm = 2 if use_bf16 else 4

    # Lane-dense hidden dim (padding applied once tile sizes are fixed).
    H_p = _round_up(H, 128)

    # Output lane padding only when it is cheap relative to useful bytes.
    if D_out % 128 == 0 or D_out < 64:
        D_out_p = D_out
    else:
        D_out_p = _round_up(D_out, 128)

    # Generation-aware VMEM budget (v7x: 64 MiB/core, v5e/v6e: 128 MiB).
    vmem_cap = _vmem_capacity_bytes()
    budget = int(0.75 * vmem_cap)

    if tile_n is None:
        tile_n = 512 if vmem_cap >= (100 << 20) else 256
    tile_n = _round_up(min(tile_n, _round_up(N, 8)), 8)

    x_bufs = 3 if D_in <= 256 else 2  # deeper x pipeline when the fetch is short

    def resident_vmem(tn):
        return (x_bufs * tn * D_in * itm             # x tiles
                + 2 * tn * D_out_p * 4               # out tiles (f32)
                + (D_in * H_p + H_p * D_out_p) * itm  # weights, single-buffered
                + (H_p + D_out_p) * 4                # biases (f32)
                + tn * H_p * 4)                      # live hidden value (f32)

    def htiled_vmem(tn, th):
        return (2 * tn * D_in * itm
                + 2 * (D_in * th + th * D_out_p) * itm
                + 2 * th * 4 + D_out_p * 4
                + 2 * tn * D_out_p * 4
                + tn * D_out_p * 4                   # accumulator scratch
                + tn * th * 4)                       # live hidden chunk

    use_resident = not force_h_tiling
    if use_resident:
        while resident_vmem(tile_n) > budget and tile_n > 8:
            tile_n = max(8, _round_up(tile_n // 2, 8))
        use_resident = resident_vmem(tile_n) <= budget

    if not use_resident:
        if tile_h is None:
            tile_h = 512
        tile_h = min(_round_up(tile_h, 128), H_p)
        while htiled_vmem(tile_n, tile_h) > budget and (tile_h > 128 or tile_n > 8):
            if tile_h > 128:
                tile_h = max(128, _round_up(tile_h // 2, 128))
            else:
                tile_n = max(8, _round_up(tile_n // 2, 8))
        H_p = _round_up(H, tile_h)  # whole number of hidden chunks

    N_p = _round_up(N, tile_n)
    grid_n = N_p // tile_n
    if grid_n < 3:
        x_bufs = 2

    # ---- Pad + cast host-side operands (padding is numerically inert). ----
    if H_p != H:
        w1 = jnp.pad(w1, ((0, 0), (0, H_p - H)))
        b1 = jnp.pad(b1, (0, H_p - H))
        w2 = jnp.pad(w2, ((0, H_p - H), (0, 0)))
    if D_out_p != D_out:
        w2 = jnp.pad(w2, ((0, 0), (0, D_out_p - D_out)))
        b2 = jnp.pad(b2, (0, D_out_p - D_out))
    if N_p != N:
        x = jnp.pad(x, ((0, N_p - N), (0, 0)))

    x = x.astype(mm_dtype)
    w1 = w1.astype(mm_dtype)
    w2 = w2.astype(mm_dtype)
    b1_2d = b1.reshape(1, H_p).astype(jnp.float32)
    b2_2d = b2.reshape(1, D_out_p).astype(jnp.float32)

    est = resident_vmem(tile_n) if use_resident else htiled_vmem(tile_n, tile_h)
    vmem_limit = int(min(budget, max(est + (4 << 20), 16 << 20)))

    flops = 2 * N_p * (D_in * H_p + H_p * D_out_p)
    bytes_accessed = (N_p * D_in * itm
                      + (D_in * H_p + H_p * D_out_p) * itm
                      + (H_p + D_out_p) * 4
                      + N_p * D_out_p * 4)
    cost = pl.CostEstimate(flops=flops, transcendentals=0,
                           bytes_accessed=bytes_accessed)

    def _run(use_hints):
        w_kw = dict(pipeline_mode=pl.Buffered(1)) if use_hints else {}
        x_kw = dict(pipeline_mode=pl.Buffered(x_bufs)) if use_hints else {}
        if use_resident:
            return pl.pallas_call(
                _resident_kernel,
                out_shape=jax.ShapeDtypeStruct((N_p, D_out_p), out_dtype),
                grid=(grid_n,),
                in_specs=[
                    pl.BlockSpec((tile_n, D_in), lambda i: (i, 0), **x_kw),
                    pl.BlockSpec((D_in, H_p), lambda i: (0, 0), **w_kw),
                    pl.BlockSpec((1, H_p), lambda i: (0, 0), **w_kw),
                    pl.BlockSpec((H_p, D_out_p), lambda i: (0, 0), **w_kw),
                    pl.BlockSpec((1, D_out_p), lambda i: (0, 0), **w_kw),
                ],
                out_specs=pl.BlockSpec((tile_n, D_out_p), lambda i: (i, 0)),
                compiler_params=pltpu.CompilerParams(
                    dimension_semantics=("parallel",),
                    vmem_limit_bytes=vmem_limit),
                cost_estimate=cost,
            )(x, w1, b1_2d, w2, b2_2d)
        else:
            grid_h = H_p // tile_h
            return pl.pallas_call(
                _htiled_kernel,
                out_shape=jax.ShapeDtypeStruct((N_p, D_out_p), out_dtype),
                grid=(grid_n, grid_h),
                in_specs=[
                    pl.BlockSpec((tile_n, D_in), lambda i, j: (i, 0)),
                    pl.BlockSpec((D_in, tile_h), lambda i, j: (0, j)),
                    pl.BlockSpec((1, tile_h), lambda i, j: (0, j)),
                    pl.BlockSpec((tile_h, D_out_p), lambda i, j: (j, 0)),
                    pl.BlockSpec((1, D_out_p), lambda i, j: (0, 0), **w_kw),
                ],
                out_specs=pl.BlockSpec((tile_n, D_out_p), lambda i, j: (i, 0)),
                scratch_shapes=[pltpu.VMEM((tile_n, D_out_p), jnp.float32)],
                compiler_params=pltpu.CompilerParams(
                    dimension_semantics=("parallel", "arbitrary"),
                    vmem_limit_bytes=vmem_limit),
                cost_estimate=cost,
            )(x, w1, b1_2d, w2, b2_2d)

    try:
        out = _run(True)
    except Exception:
        # pipeline_mode buffering hints unsupported on this build — retry plain.
        out = _run(False)

    if N_p != N or D_out_p != D_out:
        out = out[:N, :D_out]
    return out


def _reference(x, w1, b1, w2, b2):
    h = jnp.maximum(x @ w1 + b1, 0.0)
    return h @ w2 + b2


if __name__ == "__main__":
    # Small shapes consistent with the module: N x D_in -> H -> D_out
    N, D_in, H, D_out = 8, 32, 64, 16

    key = jax.random.PRNGKey(0)
    kx, k1, kb1, k2, kb2 = jax.random.split(key, 5)

    # Deterministic init mimicking torch.nn.Linear (uniform +-1/sqrt(fan_in)).
    x = jax.random.normal(kx, (N, D_in), dtype=jnp.float32)
    lim1 = 1.0 / (D_in ** 0.5)
    w1 = jax.random.uniform(k1, (D_in, H), jnp.float32, -lim1, lim1)
    b1 = jax.random.uniform(kb1, (H,), jnp.float32, -lim1, lim1)
    lim2 = 1.0 / (H ** 0.5)
    w2 = jax.random.uniform(k2, (H, D_out), jnp.float32, -lim2, lim2)
    b2 = jax.random.uniform(kb2, (D_out,), jnp.float32, -lim2, lim2)

    # 1) Resident-weight path.
    y = jax.block_until_ready(two_layer_net(x, w1, b1, w2, b2))
    y_ref = _reference(x, w1, b1, w2, b2)
    assert y.shape == (N, D_out)
    assert jnp.allclose(y, y_ref, atol=1e-5, rtol=1e-5)

    # 2) Multiple batch tiles + N padding (N=40, tile_n=16 -> 3 grid steps).
    N2 = 40
    x2 = jax.random.normal(jax.random.PRNGKey(1), (N2, D_in), dtype=jnp.float32)
    y2 = jax.block_until_ready(two_layer_net(x2, w1, b1, w2, b2, tile_n=16))
    assert y2.shape == (N2, D_out)
    assert jnp.allclose(y2, _reference(x2, w1, b1, w2, b2), atol=1e-5, rtol=1e-5)

    # 3) Hidden-dim-tiled accumulator path (forced), H spans 2 chunks of 128.
    H3 = 192
    k3, kb3, k4, kb4 = jax.random.split(jax.random.PRNGKey(2), 4)
    w1b = jax.random.uniform(k3, (D_in, H3), jnp.float32, -lim1, lim1)
    b1b = jax.random.uniform(kb3, (H3,), jnp.float32, -lim1, lim1)
    lim3 = 1.0 / (H3 ** 0.5)
    w2b = jax.random.uniform(k4, (H3, D_out), jnp.float32, -lim3, lim3)
    b2b = jax.random.uniform(kb4, (D_out,), jnp.float32, -lim3, lim3)
    y3 = jax.block_until_ready(
        two_layer_net(x, w1b, b1b, w2b, b2b, force_h_tiling=True, tile_h=128))
    assert y3.shape == (N, D_out)
    assert jnp.allclose(y3, _reference(x, w1b, b1b, w2b, b2b),
                        atol=1e-4, rtol=1e-4)

    print("KERNEL_OK")
</pallas_src>

<mosaic_0001>
module attributes {stable_mosaic.version = 11 : i64} {
  func.func @_resident_kernel(%arg0: i32, %arg1: memref<8x32xf32, #tpu.memory_space<vmem>>, %arg2: memref<32x128xf32, #tpu.memory_space<vmem>>, %arg3: memref<1x128xf32, #tpu.memory_space<vmem>>, %arg4: memref<128x16xf32, #tpu.memory_space<vmem>>, %arg5: memref<1x16xf32, #tpu.memory_space<vmem>>, %arg6: memref<8x16xf32, #tpu.memory_space<vmem>>) attributes {dimension_semantics = [#tpu.dimension_semantics<parallel>], iteration_bounds = array<i64: 1>, scalar_prefetch = 0 : i64, scratch_operands = 0 : i64, tpu.core_type = #tpu.core_type<tc>, window_params = [{pipeline_mode = #tpu.pipeline_mode<double_buffered>, transform_indices = @transform_0, window_bounds = array<i64: 8, 32>}, {pipeline_mode = #tpu.pipeline_mode<synchronous>, transform_indices = @transform_1, window_bounds = array<i64: 32, 128>}, {pipeline_mode = #tpu.pipeline_mode<synchronous>, transform_indices = @transform_2, window_bounds = array<i64: 1, 128>}, {pipeline_mode = #tpu.pipeline_mode<synchronous>, transform_indices = @transform_3, window_bounds = array<i64: 128, 16>}, {pipeline_mode = #tpu.pipeline_mode<synchronous>, transform_indices = @transform_4, window_bounds = array<i64: 1, 16>}, {transform_indices = @transform_5, window_bounds = array<i64: 8, 16>}]} {
    %c0 = arith.constant 0 : index
    %c0_0 = arith.constant 0 : index
    %0 = vector.load %arg1[%c0, %c0_0] : memref<8x32xf32, #tpu.memory_space<vmem>>, vector<8x32xf32>
    %c0_1 = arith.constant 0 : index
    %c0_2 = arith.constant 0 : index
    %1 = vector.load %arg2[%c0_1, %c0_2] : memref<32x128xf32, #tpu.memory_space<vmem>>, vector<32x128xf32>
    %cst = arith.constant dense<0.000000e+00> : vector<8x128xf32>
    %2 = tpu.matmul %0, %1, %cst {dimension_numbers = #tpu.dot_dimension_numbers<[1], [0], [0], [1], [0, 0, 1, 1], [], []>} : vector<8x32xf32>, vector<32x128xf32>, vector<8x128xf32> -> vector<8x128xf32>
    %c0_3 = arith.constant 0 : index
    %c0_4 = arith.constant 0 : index
    %3 = vector.load %arg3[%c0_3, %c0_4] : memref<1x128xf32, #tpu.memory_space<vmem>>, vector<1x128xf32>
    %4 = vector.broadcast %3 : vector<1x128xf32> to vector<8x128xf32>
    %5 = arith.addf %2, %4 : vector<8x128xf32>
    %cst_5 = arith.constant 0.000000e+00 : f32
    %6 = vector.broadcast %cst_5 : f32 to vector<8x128xf32>
    %7 = arith.maximumf %5, %6 : vector<8x128xf32>
    %c0_6 = arith.constant 0 : index
    %c0_7 = arith.constant 0 : index
    %8 = vector.load %arg4[%c0_6, %c0_7] : memref<128x16xf32, #tpu.memory_space<vmem>>, vector<128x16xf32>
    %cst_8 = arith.constant dense<0.000000e+00> : vector<8x16xf32>
    %9 = tpu.matmul %7, %8, %cst_8 {dimension_numbers = #tpu.dot_dimension_numbers<[1], [0], [0], [1], [0, 0, 1, 1], [], []>} : vector<8x128xf32>, vector<128x16xf32>, vector<8x16xf32> -> vector<8x16xf32>
    %c0_9 = arith.constant 0 : index
    %c0_10 = arith.constant 0 : index
    %10 = vector.load %arg5[%c0_9, %c0_10] : memref<1x16xf32, #tpu.memory_space<vmem>>, vector<1x16xf32>
    %11 = vector.broadcast %10 : vector<1x16xf32> to vector<8x16xf32>
    %12 = arith.addf %9, %11 : vector<8x16xf32>
    %c0_11 = arith.constant 0 : index
    %c0_12 = arith.constant 0 : index
    %13 = vector.load %arg6[%c0_11, %c0_12] : memref<8x16xf32, #tpu.memory_space<vmem>>, vector<8x16xf32>
    tpu.vector_store %arg6[%c0_11, %c0_12], %12 {strides = array<i32>} : memref<8x16xf32, #tpu.memory_space<vmem>>, vector<8x16xf32>,
    return
  }
  func.func @transform_0(%arg0: i32) -> (i32, i32) {
    %c0_i32 = arith.constant 0 : i32
    %c0_i32_0 = arith.constant 0 : i32
    return %arg0, %c0_i32 : i32, i32
  }
  func.func @transform_1(%arg0: i32) -> (i32, i32) {
    %c0_i32 = arith.constant 0 : i32
    %c0_i32_0 = arith.constant 0 : i32
    %c0_i32_1 = arith.constant 0 : i32
    return %c0_i32, %c0_i32_0 : i32, i32
  }
  func.func @transform_2(%arg0: i32) -> (i32, i32) {
    %c0_i32 = arith.constant 0 : i32
    %c0_i32_0 = arith.constant 0 : i32
    %c0_i32_1 = arith.constant 0 : i32
    return %c0_i32, %c0_i32_0 : i32, i32
  }
  func.func @transform_3(%arg0: i32) -> (i32, i32) {
    %c0_i32 = arith.constant 0 : i32
    %c0_i32_0 = arith.constant 0 : i32
    %c0_i32_1 = arith.constant 0 : i32
    return %c0_i32, %c0_i32_0 : i32, i32
  }
  func.func @transform_4(%arg0: i32) -> (i32, i32) {
    %c0_i32 = arith.constant 0 : i32
    %c0_i32_0 = arith.constant 0 : i32
    %c0_i32_1 = arith.constant 0 : i32
    return %c0_i32, %c0_i32_0 : i32, i32
  }
  func.func @transform_5(%arg0: i32) -> (i32, i32) {
    %c0_i32 = arith.constant 0 : i32
    %c0_i32_0 = arith.constant 0 : i32
    return %arg0, %c0_i32 : i32, i32
  }
}

module attributes {stable_mosaic.version = 11 : i64} {
  func.func @_resident_kernel(%arg0: i32, %arg1: memref<8x32xf32, #tpu.memory_space<vmem>>, %arg2: memref<32x128xf32, #tpu.memory_space<vmem>>, %arg3: memref<1x128xf32, #tpu.memory_space<vmem>>, %arg4: memref<128x16xf32, #tpu.memory_space<vmem>>, %arg5: memref<1x16xf32, #tpu.memory_space<vmem>>, %arg6: memref<8x16xf32, #tpu.memory_space<vmem>>) attributes {dimension_semantics = [#tpu.dimension_semantics<parallel>], iteration_bounds = array<i64: 1>, scalar_prefetch = 0 : i64, scratch_operands = 0 : i64, tpu.core_type = #tpu.core_type<tc>, window_params = [{transform_indices = @transform_0, window_bounds = array<i64: 8, 32>}, {pipeline_mode = #tpu.pipeline_mode<synchronous>, transform_indices = @transform_1, window_bounds = array<i64: 32, 128>}, {pipeline_mode = #tpu.pipeline_mode<synchronous>, transform_indices = @transform_2, window_bounds = array<i64: 1, 128>}, {pipeline_mode = #tpu.pipeline_mode<synchronous>, transform_indices = @transform_3, window_bounds = array<i64: 128, 16>}, {pipeline_mode = #tpu.pipeline_mode<synchronous>, transform_indices = @transform_4, window_bounds = array<i64: 1, 16>}, {transform_indices = @transform_5, window_bounds = array<i64: 8, 16>}]} {
    %c0 = arith.constant 0 : index
    %c0_0 = arith.constant 0 : index
    %0 = vector.load %arg1[%c0, %c0_0] : memref<8x32xf32, #tpu.memory_space<vmem>>, vector<8x32xf32>
    %c0_1 = arith.constant 0 : index
    %c0_2 = arith.constant 0 : index
    %1 = vector.load %arg2[%c0_1, %c0_2] : memref<32x128xf32, #tpu.memory_space<vmem>>, vector<32x128xf32>
    %cst = arith.constant dense<0.000000e+00> : vector<8x128xf32>
    %2 = tpu.matmul %0, %1, %cst {dimension_numbers = #tpu.dot_dimension_numbers<[1], [0], [0], [1], [0, 0, 1, 1], [], []>} : vector<8x32xf32>, vector<32x128xf32>, vector<8x128xf32> -> vector<8x128xf32>
    %c0_3 = arith.constant 0 : index
    %c0_4 = arith.constant 0 : index
    %3 = vector.load %arg3[%c0_3, %c0_4] : memref<1x128xf32, #tpu.memory_space<vmem>>, vector<1x128xf32>
    %4 = vector.broadcast %3 : vector<1x128xf32> to vector<8x128xf32>
    %5 = arith.addf %2, %4 : vector<8x128xf32>
    %cst_5 = arith.constant 0.000000e+00 : f32
    %6 = vector.broadcast %cst_5 : f32 to vector<8x128xf32>
    %7 = arith.maximumf %5, %6 : vector<8x128xf32>
    %c0_6 = arith.constant 0 : index
    %c0_7 = arith.constant 0 : index
    %8 = vector.load %arg4[%c0_6, %c0_7] : memref<128x16xf32, #tpu.memory_space<vmem>>, vector<128x16xf32>
    %cst_8 = arith.constant dense<0.000000e+00> : vector<8x16xf32>
    %9 = tpu.matmul %7, %8, %cst_8 {dimension_numbers = #tpu.dot_dimension_numbers<[1], [0], [0], [1], [0, 0, 1, 1], [], []>} : vector<8x128xf32>, vector<128x16xf32>, vector<8x16xf32> -> vector<8x16xf32>
    %c0_9 = arith.constant 0 : index
    %c0_10 = arith.constant 0 : index
    %10 = vector.load %arg5[%c0_9, %c0_10] : memref<1x16xf32, #tpu.memory_space<vmem>>, vector<1x16xf32>
    %11 = vector.broadcast %10 : vector<1x16xf32> to vector<8x16xf32>
    %12 = arith.addf %9, %11 : vector<8x16xf32>
    %c0_11 = arith.constant 0 : index
    %c0_12 = arith.constant 0 : index
    %13 = vector.load %arg6[%c0_11, %c0_12] : memref<8x16xf32, #tpu.memory_space<vmem>>, vector<8x16xf32>
    tpu.vector_store %arg6[%c0_11, %c0_12], %12 {strides = array<i32>} : memref<8x16xf32, #tpu.memory_space<vmem>>, vector<8x16xf32>,
    return
  }
  func.func @transform_0(%arg0: i32) -> (i32, i32) {
    %c0_i32 = arith.constant 0 : i32
    %c0_i32_0 = arith.constant 0 : i32
    return %arg0, %c0_i32 : i32, i32
  }
  func.func @transform_1(%arg0: i32) -> (i32, i32) {
    %c0_i32 = arith.constant 0 : i32
    %c0_i32_0 = arith.constant 0 : i32
    %c0_i32_1 = arith.constant 0 : i32
    return %c0_i32, %c0_i32_0 : i32, i32
  }
  func.func @transform_2(%arg0: i32) -> (i32, i32) {
    %c0_i32 = arith.constant 0 : i32
    %c0_i32_0 = arith.constant 0 : i32
    %c0_i32_1 = arith.constant 0 : i32
    return %c0_i32, %c0_i32_0 : i32, i32
  }
  func.func @transform_3(%arg0: i32) -> (i32, i32) {
    %c0_i32 = arith.constant 0 : i32
    %c0_i32_0 = arith.constant 0 : i32
    %c0_i32_1 = arith.constant 0 : i32
    return %c0_i32, %c0_i32_0 : i32, i32
  }
  func.func @transform_4(%arg0: i32) -> (i32, i32) {
    %c0_i32 = arith.constant 0 : i32
    %c0_i32_0 = arith.constant 0 : i32
    %c0_i32_1 = arith.constant 0 : i32
    return %c0_i32, %c0_i32_0 : i32, i32
  }
  func.func @transform_5(%arg0: i32) -> (i32, i32) {
    %c0_i32 = arith.constant 0 : i32
    %c0_i32_0 = arith.constant 0 : i32
    return %arg0, %c0_i32 : i32, i32
  }
}

</mosaic_0001>

<bundles_post_ra>
// kernel: tpu_custom_call.1
= control target key start
LH: loop header
LB: loop body
LE: loop exit
PB: predicated region body
PF: predicated region fallthrough
CT: control target
= control target key end

     0   :  { %v346_v3 = vmov 0.0|0.0   ;;  %vm347_vm0 = vmmov 0   ;;  %v348_v6 = vmov 0.0   ;;  %s461_s0 = inlined_call_operand.vmem [shape: f32[8,32], index: 0, kind: input, shape index: {}]   ;;  %s462_s1 = inlined_call_operand.vmem [shape: f32[32,128], index: 1, kind: input, shape index: {}]   ;;  %s463_s2 = inlined_call_operand.vmem [shape: f32[1,128], index: 2, kind: input, shape index: {}]   ;;  %s464_s3 = inlined_call_operand.vmem [shape: f32[128,16], index: 3, kind: input, shape index: {}]   ;;  %s465_s4 = inlined_call_operand.vmem [shape: f32[1,16], index: 4, kind: input, shape index: {}]   ;;  %s466_s5 = inlined_call_operand.hbm [shape: f32[8,16], index: 5, kind: output, shape index: {}]  }
   0x1   :  { %v22_v0 = vld [vmem:[%s462_s1] sm:$0xff]  ;;  %v23_v1 = vld [vmem:[%s462_s1 + $0x8] sm:$0xff]  ;;  %v24_v2 = vld [vmem:[%s462_s1 + $0x10] sm:$0xff]  ;;  %288 = vmatprep.subr.bf16.mxu0 %v346_v3  ;;  %250 = vmatprep.mubr.msk.f32.mxu0 %vm347_vm0, %v348_v6 }
   0x2   :  { %v289_v4 = vpack.c.bf16 %v23_v1, %v22_v0  ;;  %v25_v5 = vld [vmem:[%s462_s1 + $0x18] sm:$0xff]  ;;  %v108_v7 = vld [vmem:[%s464_s3] sm:$0xff]  ;;  %294 = vmatprep.subr.bf16.mxu1 %v346_v3  ;;  %v109_v8 = vld [vmem:[%s464_s3 + $0x8] sm:$0xff]  ;;  %285 = vmatprep.mubr.msk.f32.mxu1 %vm347_vm0, %v348_v6 }
   0x3   :  { %v110_v9 = vld [vmem:[%s464_s3 + $0x10] sm:$0xff]  ;;  %v111_v10 = vld [vmem:[%s464_s3 + $0x18] sm:$0xff]  ;;  %v292_v11 = vpack.c.bf16 %v25_v5, %v24_v2  ;;  %v295_v12 = vpack.c.bf16 %v109_v8, %v108_v7  ;;  %v112_v14 = vld [vmem:[%s464_s3 + $0x20] sm:$0xff] }
   0x4   :  { %290 = vmatpush3.bf16.msra.mxu0 %v289_v4  ;;  %v298_v13 = vpack.c.bf16 %v111_v10, %v110_v9  ;;  %v113_v15 = vld [vmem:[%s464_s3 + $0x28] sm:$0xff] }
   0x5   :  { %291 = vmatprep.subr.bf16.mxu0 %v346_v3  ;;  %296 = vmatpush3.bf16.msra.mxu1 %v295_v12 }
   0x6   :  { %297 = vmatprep.subr.bf16.mxu1 %v346_v3 }
   0x7   :  { %10 = vsyncpa [#allocation3], 0  ;;  %v21_v16 = vld [vmem:[%s461_s0] sm:$0xff]  ;;  %vm33_vm1 = vcmask 261120   ;;  %v301_v17 = vpack.c.bf16 %v113_v15, %v112_v14  ;;  %v114_v18 = vld [vmem:[%s464_s3 + $0x30] sm:$0xff]  ;;  %s349_s11 = smov [#allocation2]  }
   0x8   :  { %293 = vmatpush3.bf16.msra.mxu0 %v292_v11  ;;  %v115_v19 = vld [vmem:[%s464_s3 + $0x38] sm:$0xff]  ;;  %v116_v21 = vld [vmem:[%s464_s3 + $0x40] sm:$0xff]  ;;  %v117_v22 = vld [vmem:[%s464_s3 + $0x48] sm:$0xff]  ;;  %s209_s12 = sshll.u32 %s349_s11, 4  ;;  %vm201_vm2 = vcmask 130048   ;;  %s210_s12 = int_to_ptr.vmem [resolvable:$true] %s209_s12 }
   0x9   :  { %299 = vmatpush3.bf16.msra.mxu1 %v298_v13  ;;  %v304_v20 = vpack.c.bf16 %v115_v19, %v114_v18  ;;  %v307_v23 = vpack.c.bf16 %v117_v22, %v116_v21  ;;  %v118_v24 = vld [vmem:[%s464_s3 + $0x50] sm:$0xff]  ;;  %v119_v25 = vld [vmem:[%s464_s3 + $0x58] sm:$0xff]  ;;  %v120_v27 = vld [vmem:[%s464_s3 + $0x60] sm:$0xff]  ;;  %p327_p1 = scmp.lt.s32.totalorder %s210_s12, %s210_s12 }
   0xa   :  { %300 = vmatprep.subr.bf16.mxu1 %v346_v3  ;;  %v310_v26 = vpack.c.bf16 %v119_v25, %v118_v24  ;;  %v121_v28 = vld [vmem:[%s464_s3 + $0x68] sm:$0xff]  ;;  %v122_v30 = vld [vmem:[%s464_s3 + $0x70] sm:$0xff]  ;;  %v123_v31 = vld [vmem:[%s464_s3 + $0x78] sm:$0xff]  ;;  %s322_s3 = scalar_lea.vmem %s210_s12, 128 }
   0xb   :  { %251 = vmatmul.mubr.msk.f32.vlgmr.msra.gmra.mrb[0].mxu0 %vm33_vm1, %v21_v16  ;;  %v313_v29 = vpack.c.bf16 %v121_v28, %v120_v27  ;;  %v316_v32 = vpack.c.bf16 %v123_v31, %v122_v30  ;;  %v217_v33 = vld [vmem:[%s463_s2] ss:$0 sm:$0xff]  ;;  %p323_p0 = scmp.ne.s32.totalorder %s210_s12, %s322_s3  ;;  %p328_p2 = scmp.lt.s32.totalorder %s322_s3, %s322_s3 }
   0xc   :  { %v219_v38 = vld [vmem:[%s465_s4] ss:$0 sm:$0xff] }
   0xd   :  { %302 = vmatpush3.bf16.msra.mxu1 %v301_v17  ;;  %p329_p3 = por %p328_p2, %p327_p1 }
   0xe   :  { %303 = vmatprep.subr.bf16.mxu1 %v346_v3 }
   0xf   :  { %p330_p4 = pnand %p329_p3, %p323_p0 }
  0x11   :  { %305 = vmatpush3.bf16.msra.mxu1 %v304_v20 }
  0x12   :  { %306 = vmatprep.subr.bf16.mxu1 %v346_v3 }
  0x15   :  { %308 = vmatpush3.bf16.msra.mxu1 %v307_v23 }
  0x16   :  { %309 = vmatprep.subr.bf16.mxu1 %v346_v3 }
  0x19   :  { %311 = vmatpush3.bf16.msra.mxu1 %v310_v26 }
  0x1a   :  { %312 = vmatprep.subr.bf16.mxu1 %v346_v3 }
  0x1d   :  { %314 = vmatpush3.bf16.msra.mxu1 %v313_v29 }
  0x1e   :  { %315 = vmatprep.subr.bf16.mxu1 %v346_v3 }
  0x21   :  { %317 = vmatpush3.bf16.msra.mxu1 %v316_v32 }
  0xde   :  { %v103_v34 = vpop.f32.mrb[0].mxu0 }
  0xdf   :  { %v104_v35 = vadd.f32 %v217_v33, %v103_v34  ;;  %v252_v36 = vpop.f32.mrb[1].mxu0 }
  0xe1   :  { %v107_v37 = vmax.f32 %v104_v35, 0.0 }
  0xe3   :  { %286 = vmatmul.mubr.f32.vlgmr.msra.gmra.mrb[0].mxu1 %v107_v37 }
 0x1b6   :  { %v197_v39 = vpop.f32.mrb[0].mxu1 }
 0x1b7   :  { %v198_v40 = vadd.f32 %v219_v38, %v197_v39  ;;  %v287_v41 = vpop.f32.mrb[1].mxu1 }
 0x1b9   :  { %202 = vst.msk [vmem:[#allocation2] sm:$0xff] %vm201_vm2, %v198_v40 }
 0x1ba   :  { %333 = shalt.err (!%p330_p4)
}
 0x1bb   :  { %s334_s14 = scalar_lea.hbm %s466_s5, 128 }
 0x1bc   :  { %p335_p5 = scmp.ne.s32.totalorder %s466_s5, %s334_s14  ;;  %p338_p6 = scmp.lt.u32.totalorder %s334_s14, %s466_s5 }
 0x1be   :  { %p340_p7 = pnand %p338_p6, %p335_p5 }
 0x1c0   :  { %343 = shalt.err (!%p340_p7)
}
 0x1c1   :  { %212 = dma.vmem_to_hbm [thread:$0]  %s210_s12, 128, %s466_s5, [#allocation3]  }
 0x1c2   :  { %344 = dma.done.wait [#allocation3], 128  }
 0x1c3   :  { %345 = vsyncadd [#allocation3], 4294967168 }
 0x1c4   :  { %216 = vsyncpa [#allocation3], 1 }

// kernel: tpu_custom_call.1
= control target key start
LH: loop header
LB: loop body
LE: loop exit
PB: predicated region body
PF: predicated region fallthrough
CT: control target
= control target key end

     0   :  { %v346_v3 = vmov 0.0|0.0   ;;  %vm347_vm0 = vmmov 0   ;;  %v348_v6 = vmov 0.0   ;;  %s461_s0 = inlined_call_operand.vmem [shape: f32[8,32], index: 0, kind: input, shape index: {}]   ;;  %s462_s1 = inlined_call_operand.vmem [shape: f32[32,128], index: 1, kind: input, shape index: {}]   ;;  %s463_s2 = inlined_call_operand.vmem [shape: f32[1,128], index: 2, kind: input, shape index: {}]   ;;  %s464_s3 = inlined_call_operand.vmem [shape: f32[128,16], index: 3, kind: input, shape index: {}]   ;;  %s465_s4 = inlined_call_operand.vmem [shape: f32[1,16], index: 4, kind: input, shape index: {}]   ;;  %s466_s5 = inlined_call_operand.hbm [shape: f32[8,16], index: 5, kind: output, shape index: {}]  }
   0x1   :  { %v22_v0 = vld [vmem:[%s462_s1] sm:$0xff]  ;;  %v23_v1 = vld [vmem:[%s462_s1 + $0x8] sm:$0xff]  ;;  %v24_v2 = vld [vmem:[%s462_s1 + $0x10] sm:$0xff]  ;;  %288 = vmatprep.subr.bf16.mxu0 %v346_v3  ;;  %250 = vmatprep.mubr.msk.f32.mxu0 %vm347_vm0, %v348_v6 }
   0x2   :  { %v289_v4 = vpack.c.bf16 %v23_v1, %v22_v0  ;;  %v25_v5 = vld [vmem:[%s462_s1 + $0x18] sm:$0xff]  ;;  %v108_v7 = vld [vmem:[%s464_s3] sm:$0xff]  ;;  %294 = vmatprep.subr.bf16.mxu1 %v346_v3  ;;  %v109_v8 = vld [vmem:[%s464_s3 + $0x8] sm:$0xff]  ;;  %285 = vmatprep.mubr.msk.f32.mxu1 %vm347_vm0, %v348_v6 }
   0x3   :  { %v110_v9 = vld [vmem:[%s464_s3 + $0x10] sm:$0xff]  ;;  %v111_v10 = vld [vmem:[%s464_s3 + $0x18] sm:$0xff]  ;;  %v292_v11 = vpack.c.bf16 %v25_v5, %v24_v2  ;;  %v295_v12 = vpack.c.bf16 %v109_v8, %v108_v7  ;;  %v112_v14 = vld [vmem:[%s464_s3 + $0x20] sm:$0xff] }
   0x4   :  { %290 = vmatpush3.bf16.msra.mxu0 %v289_v4  ;;  %v298_v13 = vpack.c.bf16 %v111_v10, %v110_v9  ;;  %v113_v15 = vld [vmem:[%s464_s3 + $0x28] sm:$0xff] }
   0x5   :  { %291 = vmatprep.subr.bf16.mxu0 %v346_v3  ;;  %296 = vmatpush3.bf16.msra.mxu1 %v295_v12 }
   0x6   :  { %297 = vmatprep.subr.bf16.mxu1 %v346_v3 }
   0x7   :  { %10 = vsyncpa [#allocation3], 0  ;;  %v21_v16 = vld [vmem:[%s461_s0] sm:$0xff]  ;;  %vm33_vm1 = vcmask 261120   ;;  %v301_v17 = vpack.c.bf16 %v113_v15, %v112_v14  ;;  %v114_v18 = vld [vmem:[%s464_s3 + $0x30] sm:$0xff]  ;;  %s349_s11 = smov [#allocation2]  }
   0x8   :  { %293 = vmatpush3.bf16.msra.mxu0 %v292_v11  ;;  %v115_v19 = vld [vmem:[%s464_s3 + $0x38] sm:$0xff]  ;;  %v116_v21 = vld [vmem:[%s464_s3 + $0x40] sm:$0xff]  ;;  %v117_v22 = vld [vmem:[%s464_s3 + $0x48] sm:$0xff]  ;;  %s209_s12 = sshll.u32 %s349_s11, 4  ;;  %vm201_vm2 = vcmask 130048   ;;  %s210_s12 = int_to_ptr.vmem [resolvable:$true] %s209_s12 }
   0x9   :  { %299 = vmatpush3.bf16.msra.mxu1 %v298_v13  ;;  %v304_v20 = vpack.c.bf16 %v115_v19, %v114_v18  ;;  %v307_v23 = vpack.c.bf16 %v117_v22, %v116_v21  ;;  %v118_v24 = vld [vmem:[%s464_s3 + $0x50] sm:$0xff]  ;;  %v119_v25 = vld [vmem:[%s464_s3 + $0x58] sm:$0xff]  ;;  %v120_v27 = vld [vmem:[%s464_s3 + $0x60] sm:$0xff]  ;;  %p327_p1 = scmp.lt.s32.totalorder %s210_s12, %s210_s12 }
   0xa   :  { %300 = vmatprep.subr.bf16.mxu1 %v346_v3  ;;  %v310_v26 = vpack.c.bf16 %v119_v25, %v118_v24  ;;  %v121_v28 = vld [vmem:[%s464_s3 + $0x68] sm:$0xff]  ;;  %v122_v30 = vld [vmem:[%s464_s3 + $0x70] sm:$0xff]  ;;  %v123_v31 = vld [vmem:[%s464_s3 + $0x78] sm:$0xff]  ;;  %s322_s3 = scalar_lea.vmem %s210_s12, 128 }
   0xb   :  { %251 = vmatmul.mubr.msk.f32.vlgmr.msra.gmra.mrb[0].mxu0 %vm33_vm1, %v21_v16  ;;  %v313_v29 = vpack.c.bf16 %v121_v28, %v120_v27  ;;  %v316_v32 = vpack.c.bf16 %v123_v31, %v122_v30  ;;  %v217_v33 = vld [vmem:[%s463_s2] ss:$0 sm:$0xff]  ;;  %p323_p0 = scmp.ne.s32.totalorder %s210_s12, %s322_s3  ;;  %p328_p2 = scmp.lt.s32.totalorder %s322_s3, %s322_s3 }
   0xc   :  { %v219_v38 = vld [vmem:[%s465_s4] ss:$0 sm:$0xff] }
   0xd   :  { %302 = vmatpush3.bf16.msra.mxu1 %v301_v17  ;;  %p329_p3 = por %p328_p2, %p327_p1 }
   0xe   :  { %303 = vmatprep.subr.bf16.mxu1 %v346_v3 }
   0xf   :  { %p330_p4 = pnand %p329_p3, %p323_p0 }
  0x11   :  { %305 = vmatpush3.bf16.msra.mxu1 %v304_v20 }
  0x12   :  { %306 = vmatprep.subr.bf16.mxu1 %v346_v3 }
  0x15   :  { %308 = vmatpush3.bf16.msra.mxu1 %v307_v23 }
  0x16   :  { %309 = vmatprep.subr.bf16.mxu1 %v346_v3 }
  0x19   :  { %311 = vmatpush3.bf16.msra.mxu1 %v310_v26 }
  0x1a   :  { %312 = vmatprep.subr.bf16.mxu1 %v346_v3 }
  0x1d   :  { %314 = vmatpush3.bf16.msra.mxu1 %v313_v29 }
  0x1e   :  { %315 = vmatprep.subr.bf16.mxu1 %v346_v3 }
  0x21   :  { %317 = vmatpush3.bf16.msra.mxu1 %v316_v32 }
  0xde   :  { %v103_v34 = vpop.f32.mrb[0].mxu0 }
  0xdf   :  { %v104_v35 = vadd.f32 %v217_v33, %v103_v34  ;;  %v252_v36 = vpop.f32.mrb[1].mxu0 }
  0xe1   :  { %v107_v37 = vmax.f32 %v104_v35, 0.0 }
  0xe3   :  { %286 = vmatmul.mubr.f32.vlgmr.msra.gmra.mrb[0].mxu1 %v107_v37 }
 0x1b6   :  { %v197_v39 = vpop.f32.mrb[0].mxu1 }
 0x1b7   :  { %v198_v40 = vadd.f32 %v219_v38, %v197_v39  ;;  %v287_v41 = vpop.f32.mrb[1].mxu1 }
 0x1b9   :  { %202 = vst.msk [vmem:[#allocation2] sm:$0xff] %vm201_vm2, %v198_v40 }
 0x1ba   :  { %333 = shalt.err (!%p330_p4)
}
 0x1bb   :  { %s334_s14 = scalar_lea.hbm %s466_s5, 128 }
 0x1bc   :  { %p335_p5 = scmp.ne.s32.totalorder %s466_s5, %s334_s14  ;;  %p338_p6 = scmp.lt.u32.totalorder %s334_s14, %s466_s5 }
 0x1be   :  { %p340_p7 = pnand %p338_p6, %p335_p5 }
 0x1c0   :  { %343 = shalt.err (!%p340_p7)
}
 0x1c1   :  { %212 = dma.vmem_to_hbm [thread:$0]  %s210_s12, 128, %s466_s5, [#allocation3]  }
 0x1c2   :  { %344 = dma.done.wait [#allocation3], 128  }
 0x1c3   :  { %345 = vsyncadd [#allocation3], 4294967168 }
 0x1c4   :  { %216 = vsyncpa [#allocation3], 1 }

</bundles_post_ra>
